<compile_context>
chip_gen: v6e
topology: v6e:2x2x1
jax: 0.10.0
libtpu: 0.0.40
codegen_flags: <defaults>
</compile_context>

<pallas_src>
import functools

import jax
import jax.numpy as jnp
from jax.experimental import pallas as pl
from jax.experimental.pallas import tpu as pltpu


def _round_up(x, m):
    return ((x + m - 1) // m) * m


def _resblock_kernel(x_ref, wc_ref, bc_ref, wrs_ref, brs_ref,
                     res_ref, skip_ref, *scratch,
                     kernel_size, dilation, pad, c_res, c_in, approx_sigmoid):
    """One (batch, time-tile) grid step, NCT layout (time in lanes).

    x_ref    : (1, C_in, T_TILE)       current input tile (resident in VMEM)
    wc_ref   : (k, 2*C_res, C_in)      per-tap dilated-conv weights
    bc_ref   : (2*C_res, 1)            conv bias (f32)
    wrs_ref  : (C_in + C_skip, C_res)  fused res1x1 / skip1x1 weights
    brs_ref  : (C_in + C_skip, 1)      fused res/skip bias (f32)
    res_ref  : (1, C_in, T_TILE)
    skip_ref : (1, C_skip, T_TILE)
    scratch  : (xhist_ref,) iff pad > 0 — (C_in, pad) causal-history carry
    """
    t_tile = x_ref.shape[2]
    x = x_ref[0]                                       # (C_in, T_TILE)

    if pad > 0:
        xhist_ref = scratch[0]

        # Zero the history at the first time tile of every batch element.
        @pl.when(pl.program_id(1) == 0)
        def _():
            xhist_ref[...] = jnp.zeros_like(xhist_ref)

    # Dilated causal conv: one MXU matmul per tap, accumulated in f32.
    # Newest tap (lookback 0) uses the resident input block directly -> no
    # shifted copy; older taps stitch [history tail | tile head] once each
    # (no (k*C_in, T) concatenate slab, no full-tile staging store).
    h = jnp.dot(wc_ref[kernel_size - 1], x, preferred_element_type=jnp.float32)
    for j in range(kernel_size - 1):
        lb = (kernel_size - 1 - j) * dilation          # causal lookback of tap j
        win = jnp.concatenate(
            [xhist_ref[:, pad - lb:], x[:, :t_tile - lb]], axis=1)
        h += jnp.dot(wc_ref[j], win, preferred_element_type=jnp.float32)
    h = h + bc_ref[...]                                # (2*C_res, T_TILE) f32

    # Carry the last `pad` input samples for the next time tile.
    if pad > 0:
        xhist_ref[...] = x[:, t_tile - pad:]

    # GLU: split along sublanes (offset C_res is 8-aligned), math in f32.
    # exp + approx-reciprocal both issue on the otherwise-idle EUP slot,
    # keeping the sigmoid divide off the VALU.
    h_lin, h_gate = h[:c_res], h[c_res:]
    if approx_sigmoid:
        gated = h_lin * pl.reciprocal(1.0 + jnp.exp(-h_gate), approx=True)
    else:
        gated = h_lin * jax.nn.sigmoid(h_gate)

    # Fused res1x1 + skip1x1: one matmul, outputs split along sublanes.
    out = jnp.dot(wrs_ref[...], gated.astype(wrs_ref.dtype),
                  preferred_element_type=jnp.float32)
    out = out + brs_ref[...]                           # (C_in + C_skip, T_TILE)

    res_ref[0] = (out[:c_in] + x.astype(jnp.float32)).astype(res_ref.dtype)
    skip_ref[0] = out[c_in:].astype(skip_ref.dtype)


def _vmem_bytes(*, c_in, c_skip, c_res, k, pad, t_tile, act_bytes):
    """Rough per-step VMEM working-set estimate (double-buffered I/O blocks,
    single-buffered weights x2, history scratch, f32 intermediates)."""
    two_cres = 2 * c_res
    io_blocks = 2 * (2 * c_in + c_skip) * t_tile * act_bytes
    weights = 2 * (k * two_cres * c_in + two_cres
                   + (c_in + c_skip) * (c_res + 1)) * 4
    hist = c_in * pad * act_bytes
    interm = (c_in + two_cres + c_res + c_in + c_skip) * t_tile * 4
    return io_blocks + weights + hist + interm


def resblock_forward(x_nct, torch_params, *, kernel_size, dilation,
                     t_tile=1024, compute_dtype=jnp.float32,
                     approx_sigmoid=True):
    """x_nct: (B, n_chans, T).  torch_params in PyTorch layout:
       (w_conv (2*C_res, C_in, k), b_conv (2*C_res,),
        w_res (C_in, C_res, 1),    b_res (C_in,),
        w_skip (C_skip, C_res, 1), b_skip (C_skip,)).
    Returns (res, skip) in NCT layout, dtype of x_nct."""
    wc_t, b_conv, wr_t, b_res, ws_t, b_skip = torch_params
    B, c_in, T = x_nct.shape
    k, d = kernel_size, dilation
    pad = (k - 1) * d
    two_cres = wc_t.shape[0]
    c_res = two_cres // 2
    c_skip = ws_t.shape[0]
    act_bytes = jnp.dtype(compute_dtype).itemsize

    # Time tile: lane-dense (multiple of 128), strictly longer than the causal
    # lookback, no longer than the (rounded) sequence, and auto-shrunk so the
    # working set leaves headroom inside v7x's 64 MiB VMEM.
    min_tile = _round_up(pad + 1, 128)
    t_tile = max(min_tile, min(_round_up(max(t_tile, pad + 1), 128),
                               _round_up(max(T, pad + 1), 128)))
    vmem_budget = 40 * 2**20
    while (t_tile > min_tile and
           _vmem_bytes(c_in=c_in, c_skip=c_skip, c_res=c_res, k=k, pad=pad,
                       t_tile=t_tile, act_bytes=act_bytes) > vmem_budget):
        t_tile = max(min_tile, _round_up(t_tile // 2, 128))
    t_total = _round_up(T, t_tile)

    est = _vmem_bytes(c_in=c_in, c_skip=c_skip, c_res=c_res, k=k, pad=pad,
                      t_tile=t_tile, act_bytes=act_bytes)
    vmem_limit = int(min(max(2 * est, 32 * 2**20), 64 * 2**20))

    # Single input pass: only right-pad time to a tile multiple (causal conv ->
    # the padded tail cannot influence the first T outputs; sliced off below).
    x_in = x_nct.astype(compute_dtype)
    if t_total != T:
        x_in = jnp.pad(x_in, ((0, 0), (0, 0), (0, t_total - T)))

    # Parameter packing (done once in the wrapper):
    #   conv weights per-tap stacked along the leading (sublane-cheap) axis;
    #   res1x1 / skip1x1 fused along the output-channel axis.
    wc = jnp.transpose(wc_t, (2, 0, 1)).astype(compute_dtype)   # (k, 2*C_res, C_in)
    bc = b_conv.reshape(two_cres, 1).astype(jnp.float32)
    wrs = jnp.concatenate([wr_t[:, :, 0], ws_t[:, :, 0]], axis=0)
    wrs = wrs.astype(compute_dtype)                              # (C_in+C_skip, C_res)
    brs = jnp.concatenate([b_res, b_skip]).reshape(c_in + c_skip, 1)
    brs = brs.astype(jnp.float32)

    kernel = functools.partial(
        _resblock_kernel, kernel_size=k, dilation=d, pad=pad,
        c_res=c_res, c_in=c_in, approx_sigmoid=approx_sigmoid)

    scratch_shapes = []
    if pad > 0:
        scratch_shapes.append(pltpu.VMEM((c_in, pad), compute_dtype))

    res, skip = pl.pallas_call(
        kernel,
        out_shape=(
            jax.ShapeDtypeStruct((B, c_in, t_total), x_nct.dtype),
            jax.ShapeDtypeStruct((B, c_skip, t_total), x_nct.dtype),
        ),
        grid_spec=pltpu.PrefetchScalarGridSpec(
            num_scalar_prefetch=0,
            grid=(B, t_total // t_tile),
            in_specs=[
                pl.BlockSpec((1, c_in, t_tile), lambda b, t: (b, 0, t)),
                pl.BlockSpec((k, two_cres, c_in), lambda b, t: (0, 0, 0)),
                pl.BlockSpec((two_cres, 1), lambda b, t: (0, 0)),
                pl.BlockSpec((c_in + c_skip, c_res), lambda b, t: (0, 0)),
                pl.BlockSpec((c_in + c_skip, 1), lambda b, t: (0, 0)),
            ],
            out_specs=[
                pl.BlockSpec((1, c_in, t_tile), lambda b, t: (b, 0, t)),
                pl.BlockSpec((1, c_skip, t_tile), lambda b, t: (b, 0, t)),
            ],
            scratch_shapes=scratch_shapes,
        ),
        compiler_params=pltpu.CompilerParams(
            # batch axis is independent -> "parallel" (megacore / 2-TC split);
            # time axis carries the history scratch -> "arbitrary".
            dimension_semantics=("parallel", "arbitrary"),
            vmem_limit_bytes=vmem_limit),
    )(x_in, wc, bc, wrs, brs)

    if t_total != T:
        res = res[:, :, :T]
        skip = skip[:, :, :T]
    return res, skip


def resblock_reference(x_nct, torch_params, *, kernel_size, dilation):
    """Pure-JAX reference mimicking the PyTorch module (NCT layout)."""
    wc_t, b_conv, wr_t, b_res, ws_t, b_skip = torch_params
    k, d = kernel_size, dilation
    pad = (k - 1) * d
    xp = jnp.pad(x_nct, ((0, 0), (0, 0), (pad, 0)))
    h = jax.lax.conv_general_dilated(
        xp, wc_t, window_strides=(1,), padding="VALID",
        rhs_dilation=(d,), dimension_numbers=("NCH", "OIH", "NCH"))
    h = h + b_conv[None, :, None]
    a, b = jnp.split(h, 2, axis=1)
    gated = a * jax.nn.sigmoid(b)
    res = jnp.einsum("bct,oc->bot", gated, wr_t[:, :, 0]) + b_res[None, :, None] + x_nct
    skip = jnp.einsum("bct,oc->bot", gated, ws_t[:, :, 0]) + b_skip[None, :, None]
    return res, skip


if __name__ == "__main__":
    # Small synthetic config (cfg.batch_norm = False).  n_chans* are multiples
    # of 16 so both the f32 and bf16 sublane splits / stores stay aligned.
    B, n_chans, n_chans_res, n_chans_skip = 2, 16, 16, 16
    T, kernel_size, dilation = 320, 3, 2   # padded to 3 time tiles of 128

    key = jax.random.PRNGKey(0)
    ks = jax.random.split(key, 8)

    # Parameters in PyTorch layout (out, in, k) / (out,).
    wc_t = 0.1 * jax.random.normal(ks[0], (2 * n_chans_res, n_chans, kernel_size), jnp.float32)
    b_conv = 0.1 * jax.random.normal(ks[1], (2 * n_chans_res,), jnp.float32)
    wr_t = 0.1 * jax.random.normal(ks[2], (n_chans, n_chans_res, 1), jnp.float32)
    b_res = 0.1 * jax.random.normal(ks[3], (n_chans,), jnp.float32)
    ws_t = 0.1 * jax.random.normal(ks[4], (n_chans_skip, n_chans_res, 1), jnp.float32)
    b_skip = 0.1 * jax.random.normal(ks[5], (n_chans_skip,), jnp.float32)
    torch_params = (wc_t, b_conv, wr_t, b_res, ws_t, b_skip)

    x = jax.random.normal(ks[6], (B, n_chans, T), jnp.float32)
    res_ref, skip_ref = resblock_reference(x, torch_params,
                                           kernel_size=kernel_size, dilation=dilation)

    # 1) Exact f32 path (exact sigmoid) — small tile to exercise the history carry.
    res, skip = resblock_forward(x, torch_params, kernel_size=kernel_size,
                                 dilation=dilation, t_tile=128,
                                 approx_sigmoid=False)
    jax.block_until_ready((res, skip))
    assert jnp.allclose(res, res_ref, atol=1e-4, rtol=1e-4)
    assert jnp.allclose(skip, skip_ref, atol=1e-4, rtol=1e-4)

    # 2) Default perf path (EUP exp + approx reciprocal sigmoid).
    res_a, skip_a = resblock_forward(x, torch_params, kernel_size=kernel_size,
                                     dilation=dilation, t_tile=128)
    jax.block_until_ready((res_a, skip_a))
    assert jnp.allclose(res_a, res_ref, atol=2e-2, rtol=2e-2)
    assert jnp.allclose(skip_a, skip_ref, atol=2e-2, rtol=2e-2)

    # 3) bf16 datapath (HBM-roofline lever on v6e/v7x); loose check vs f32 ref.
    res16, skip16 = resblock_forward(x, torch_params, kernel_size=kernel_size,
                                     dilation=dilation, t_tile=128,
                                     compute_dtype=jnp.bfloat16)
    jax.block_until_ready((res16, skip16))
    assert jnp.allclose(res16, res_ref, atol=1e-1, rtol=1e-1)
    assert jnp.allclose(skip16, skip_ref, atol=1e-1, rtol=1e-1)

    # 4) kernel_size == 1 (pad == 0) path: no history scratch at all.
    wc1_t = 0.1 * jax.random.normal(ks[7], (2 * n_chans_res, n_chans, 1), jnp.float32)
    params1 = (wc1_t, b_conv, wr_t, b_res, ws_t, b_skip)
    res1, skip1 = resblock_forward(x, params1, kernel_size=1, dilation=1,
                                   t_tile=128, approx_sigmoid=False)
    jax.block_until_ready((res1, skip1))
    res1_ref, skip1_ref = resblock_reference(x, params1, kernel_size=1, dilation=1)
    assert jnp.allclose(res1, res1_ref, atol=1e-4, rtol=1e-4)
    assert jnp.allclose(skip1, skip1_ref, atol=1e-4, rtol=1e-4)

    print("KERNEL_OK")
</pallas_src>

<mosaic_0001>
module attributes {stable_mosaic.version = 11 : i64} {
  func.func @_resblock_kernel(%arg0: i32, %arg1: i32, %arg2: memref<1x16x128xf32, #tpu.memory_space<vmem>>, %arg3: memref<3x32x16xf32, #tpu.memory_space<vmem>>, %arg4: memref<32x1xf32, #tpu.memory_space<vmem>>, %arg5: memref<32x16xf32, #tpu.memory_space<vmem>>, %arg6: memref<32x1xf32, #tpu.memory_space<vmem>>, %arg7: memref<1x16x128xf32, #tpu.memory_space<vmem>>, %arg8: memref<1x16x128xf32, #tpu.memory_space<vmem>>, %arg9: memref<16x4xf32, #tpu.memory_space<vmem>>) attributes {dimension_semantics = [#tpu.dimension_semantics<parallel>, #tpu.dimension_semantics<arbitrary>], iteration_bounds = array<i64: 2, 3>, scalar_prefetch = 0 : i64, scratch_operands = 1 : i64, tpu.core_type = #tpu.core_type<tc>, window_params = [{transform_indices = @transform_0, window_bounds = array<i64: 1, 16, 128>}, {pipeline_mode = #tpu.pipeline_mode<synchronous>, transform_indices = @transform_1, window_bounds = array<i64: 3, 32, 16>}, {pipeline_mode = #tpu.pipeline_mode<synchronous>, transform_indices = @transform_2, window_bounds = array<i64: 32, 1>}, {pipeline_mode = #tpu.pipeline_mode<synchronous>, transform_indices = @transform_3, window_bounds = array<i64: 32, 16>}, {pipeline_mode = #tpu.pipeline_mode<synchronous>, transform_indices = @transform_4, window_bounds = array<i64: 32, 1>}, {transform_indices = @transform_5, window_bounds = array<i64: 1, 16, 128>}, {transform_indices = @transform_6, window_bounds = array<i64: 1, 16, 128>}]} {
    %c0 = arith.constant 0 : index
    %c0_0 = arith.constant 0 : index
    %c0_1 = arith.constant 0 : index
    %0 = vector.load %arg2[%c0, %c0_0, %c0_1] : memref<1x16x128xf32, #tpu.memory_space<vmem>>, vector<1x16x128xf32>
    %1 = vector.shape_cast %0 : vector<1x16x128xf32> to vector<16x128xf32>
    %c0_i32 = arith.constant 0 : i32
    %2 = arith.cmpi eq, %arg1, %c0_i32 : i32
    %3 = arith.extui %2 : i1 to i32
    %c0_i32_2 = arith.constant 0 : i32
    %4 = arith.cmpi ne, %3, %c0_i32_2 : i32
    scf.if %4 {
      %cst_32 = arith.constant 0.000000e+00 : f32
      %49 = vector.broadcast %cst_32 : f32 to vector<16x4xf32>
      %c0_33 = arith.constant 0 : index
      %c0_34 = arith.constant 0 : index
      %50 = vector.load %arg9[%c0_33, %c0_34] : memref<16x4xf32, #tpu.memory_space<vmem>>, vector<16x4xf32>
      tpu.vector_store %arg9[%c0_33, %c0_34], %49 {strides = array<i32>} : memref<16x4xf32, #tpu.memory_space<vmem>>, vector<16x4xf32>,
    } else {
    }
    %c2 = arith.constant 2 : index
    %c0_3 = arith.constant 0 : index
    %c0_4 = arith.constant 0 : index
    %5 = vector.load %arg3[%c2, %c0_3, %c0_4] : memref<3x32x16xf32, #tpu.memory_space<vmem>>, vector<1x32x16xf32>
    %6 = vector.shape_cast %5 : vector<1x32x16xf32> to vector<32x16xf32>
    %cst = arith.constant dense<0.000000e+00> : vector<32x128xf32>
    %7 = tpu.matmul %6, %1, %cst {dimension_numbers = #tpu.dot_dimension_numbers<[1], [0], [0], [1], [0, 0, 1, 1], [], []>} : vector<32x16xf32>, vector<16x128xf32>, vector<32x128xf32> -> vector<32x128xf32>
    %c0_5 = arith.constant 0 : index
    %c0_6 = arith.constant 0 : index
    %8 = vector.load %arg9[%c0_5, %c0_6] : memref<16x4xf32, #tpu.memory_space<vmem>>, vector<16x4xf32>
    %9 = vector.extract_strided_slice %1 {offsets = [0, 0], sizes = [16, 124], strides = [1, 1]} : vector<16x128xf32> to vector<16x124xf32>
    %10 = tpu.concatenate %8, %9 in 1 : vector<16x4xf32>, vector<16x124xf32> -> vector<16x128xf32>
    %c0_7 = arith.constant 0 : index
    %c0_8 = arith.constant 0 : index
    %c0_9 = arith.constant 0 : index
    %11 = vector.load %arg3[%c0_7, %c0_8, %c0_9] : memref<3x32x16xf32, #tpu.memory_space<vmem>>, vector<1x32x16xf32>
    %12 = vector.shape_cast %11 : vector<1x32x16xf32> to vector<32x16xf32>
    %cst_10 = arith.constant dense<0.000000e+00> : vector<32x128xf32>
    %13 = tpu.matmul %12, %10, %cst_10 {dimension_numbers = #tpu.dot_dimension_numbers<[1], [0], [0], [1], [0, 0, 1, 1], [], []>} : vector<32x16xf32>, vector<16x128xf32>, vector<32x128xf32> -> vector<32x128xf32>
    %14 = arith.addf %7, %13 : vector<32x128xf32>
    %c0_11 = arith.constant 0 : index
    %c2_12 = arith.constant 2 : index
    %15 = vector.load %arg9[%c0_11, %c2_12] : memref<16x4xf32, #tpu.memory_space<vmem>>, vector<16x2xf32>
    %16 = vector.extract_strided_slice %1 {offsets = [0, 0], sizes = [16, 126], strides = [1, 1]} : vector<16x128xf32> to vector<16x126xf32>
    %17 = tpu.concatenate %15, %16 in 1 : vector<16x2xf32>, vector<16x126xf32> -> vector<16x128xf32>
    %c1 = arith.constant 1 : index
    %c0_13 = arith.constant 0 : index
    %c0_14 = arith.constant 0 : index
    %18 = vector.load %arg3[%c1, %c0_13, %c0_14] : memref<3x32x16xf32, #tpu.memory_space<vmem>>, vector<1x32x16xf32>
    %19 = vector.shape_cast %18 : vector<1x32x16xf32> to vector<32x16xf32>
    %cst_15 = arith.constant dense<0.000000e+00> : vector<32x128xf32>
    %20 = tpu.matmul %19, %17, %cst_15 {dimension_numbers = #tpu.dot_dimension_numbers<[1], [0], [0], [1], [0, 0, 1, 1], [], []>} : vector<32x16xf32>, vector<16x128xf32>, vector<32x128xf32> -> vector<32x128xf32>
    %21 = arith.addf %14, %20 : vector<32x128xf32>
    %c0_16 = arith.constant 0 : index
    %c0_17 = arith.constant 0 : index
    %22 = vector.load %arg4[%c0_16, %c0_17] : memref<32x1xf32, #tpu.memory_space<vmem>>, vector<32x1xf32>
    %23 = vector.broadcast %22 : vector<32x1xf32> to vector<32x128xf32>
    %24 = arith.addf %21, %23 : vector<32x128xf32>
    %25 = vector.extract_strided_slice %1 {offsets = [0, 124], sizes = [16, 4], strides = [1, 1]} : vector<16x128xf32> to vector<16x4xf32>
    %c0_18 = arith.constant 0 : index
    %c0_19 = arith.constant 0 : index
    %26 = vector.load %arg9[%c0_18, %c0_19] : memref<16x4xf32, #tpu.memory_space<vmem>>, vector<16x4xf32>
    tpu.vector_store %arg9[%c0_18, %c0_19], %25 {strides = array<i32>} : memref<16x4xf32, #tpu.memory_space<vmem>>, vector<16x4xf32>,
    %27 = vector.extract_strided_slice %24 {offsets = [0, 0], sizes = [16, 128], strides = [1, 1]} : vector<32x128xf32> to vector<16x128xf32>
    %28 = vector.extract_strided_slice %24 {offsets = [16, 0], sizes = [16, 128], strides = [1, 1]} : vector<32x128xf32> to vector<16x128xf32>
    %29 = arith.negf %28 : vector<16x128xf32>
    %30 = math.exp %29 : vector<16x128xf32>
    %cst_20 = arith.constant 1.000000e+00 : f32
    %31 = vector.broadcast %cst_20 : f32 to vector<16x128xf32>
    %32 = arith.addf %31, %30 : vector<16x128xf32>
    %33 = arith.divf %31, %32 : vector<16x128xf32>
    %34 = arith.mulf %27, %33 : vector<16x128xf32>
    %c0_21 = arith.constant 0 : index
    %c0_22 = arith.constant 0 : index
    %35 = vector.load %arg5[%c0_21, %c0_22] : memref<32x16xf32, #tpu.memory_space<vmem>>, vector<32x16xf32>
    %cst_23 = arith.constant dense<0.000000e+00> : vector<32x128xf32>
    %36 = tpu.matmul %35, %34, %cst_23 {dimension_numbers = #tpu.dot_dimension_numbers<[1], [0], [0], [1], [0, 0, 1, 1], [], []>} : vector<32x16xf32>, vector<16x128xf32>, vector<32x128xf32> -> vector<32x128xf32>
    %c0_24 = arith.constant 0 : index
    %c0_25 = arith.constant 0 : index
    %37 = vector.load %arg6[%c0_24, %c0_25] : memref<32x1xf32, #tpu.memory_space<vmem>>, vector<32x1xf32>
    %38 = vector.broadcast %37 : vector<32x1xf32> to vector<32x128xf32>
    %39 = arith.addf %36, %38 : vector<32x128xf32>
    %40 = vector.extract_strided_slice %39 {offsets = [0, 0], sizes = [16, 128], strides = [1, 1]} : vector<32x128xf32> to vector<16x128xf32>
    %41 = arith.addf %40, %1 : vector<16x128xf32>
    %c0_26 = arith.constant 0 : index
    %c0_27 = arith.constant 0 : index
    %c0_28 = arith.constant 0 : index
    %42 = vector.load %arg7[%c0_26, %c0_27, %c0_28] : memref<1x16x128xf32, #tpu.memory_space<vmem>>, vector<1x16x128xf32>
    %43 = vector.shape_cast %42 : vector<1x16x128xf32> to vector<16x128xf32>
    %44 = vector.shape_cast %41 : vector<16x128xf32> to vector<1x16x128xf32>
    tpu.vector_store %arg7[%c0_26, %c0_27, %c0_28], %44 {strides = array<i32>} : memref<1x16x128xf32, #tpu.memory_space<vmem>>, vector<1x16x128xf32>,
    %45 = vector.extract_strided_slice %39 {offsets = [16, 0], sizes = [16, 128], strides = [1, 1]} : vector<32x128xf32> to vector<16x128xf32>
    %c0_29 = arith.constant 0 : index
    %c0_30 = arith.constant 0 : index
    %c0_31 = arith.constant 0 : index
    %46 = vector.load %arg8[%c0_29, %c0_30, %c0_31] : memref<1x16x128xf32, #tpu.memory_space<vmem>>, vector<1x16x128xf32>
    %47 = vector.shape_cast %46 : vector<1x16x128xf32> to vector<16x128xf32>
    %48 = vector.shape_cast %45 : vector<16x128xf32> to vector<1x16x128xf32>
    tpu.vector_store %arg8[%c0_29, %c0_30, %c0_31], %48 {strides = array<i32>} : memref<1x16x128xf32, #tpu.memory_space<vmem>>, vector<1x16x128xf32>,
    return
  }
  func.func @transform_0(%arg0: i32, %arg1: i32) -> (i32, i32, i32) {
    %c0_i32 = arith.constant 0 : i32
    %c0_i32_0 = arith.constant 0 : i32
    return %arg0, %c0_i32, %arg1 : i32, i32, i32
  }
  func.func @transform_1(%arg0: i32, %arg1: i32) -> (i32, i32, i32) {
    %c0_i32 = arith.constant 0 : i32
    %c0_i32_0 = arith.constant 0 : i32
    %c0_i32_1 = arith.constant 0 : i32
    %c0_i32_2 = arith.constant 0 : i32
    return %c0_i32, %c0_i32_0, %c0_i32_1 : i32, i32, i32
  }
  func.func @transform_2(%arg0: i32, %arg1: i32) -> (i32, i32) {
    %c0_i32 = arith.constant 0 : i32
    %c0_i32_0 = arith.constant 0 : i32
    %c0_i32_1 = arith.constant 0 : i32
    return %c0_i32, %c0_i32_0 : i32, i32
  }
  func.func @transform_3(%arg0: i32, %arg1: i32) -> (i32, i32) {
    %c0_i32 = arith.constant 0 : i32
    %c0_i32_0 = arith.constant 0 : i32
    %c0_i32_1 = arith.constant 0 : i32
    return %c0_i32, %c0_i32_0 : i32, i32
  }
  func.func @transform_4(%arg0: i32, %arg1: i32) -> (i32, i32) {
    %c0_i32 = arith.constant 0 : i32
    %c0_i32_0 = arith.constant 0 : i32
    %c0_i32_1 = arith.constant 0 : i32
    return %c0_i32, %c0_i32_0 : i32, i32
  }
  func.func @transform_5(%arg0: i32, %arg1: i32) -> (i32, i32, i32) {
    %c0_i32 = arith.constant 0 : i32
    %c0_i32_0 = arith.constant 0 : i32
    return %arg0, %c0_i32, %arg1 : i32, i32, i32
  }
  func.func @transform_6(%arg0: i32, %arg1: i32) -> (i32, i32, i32) {
    %c0_i32 = arith.constant 0 : i32
    %c0_i32_0 = arith.constant 0 : i32
    return %arg0, %c0_i32, %arg1 : i32, i32, i32
  }
}

</mosaic_0001>

<bundles_post_ra>
// kernel: tpu_custom_call.1
= control target key start
LH: loop header
LB: loop body
LE: loop exit
PB: predicated region body
PF: predicated region fallthrough
CT: control target
= control target key end

     0   :  { %s1667_s0 = inlined_call_operand.vmem [shape: f32[2,16,384], index: 0, kind: input, shape index: {}]   ;;  %s1668_s1 = inlined_call_operand.vmem [shape: f32[3,32,16], index: 1, kind: input, shape index: {}]   ;;  %s1669_s2 = inlined_call_operand.vmem [shape: f32[32,1], index: 2, kind: input, shape index: {}]   ;;  %s1670_s3 = inlined_call_operand.vmem [shape: f32[32,16], index: 3, kind: input, shape index: {}]   ;;  %s1671_s4 = inlined_call_operand.vmem [shape: f32[32,1], index: 4, kind: input, shape index: {}]   ;;  %s1672_s5 = inlined_call_operand.hbm [shape: f32[2,16,384], index: 5, kind: output, shape index: {0}]   ;;  %s1673_s6 = inlined_call_operand.hbm [shape: f32[2,16,384], index: 6, kind: output, shape index: {1}]  }
   0x1   :  { %1675 = sst [smem:[#allocation11_spill]] %s1667_s0 }
   0x2   :  { %12 = vsyncpa [#allocation5], 0 }
   0x3   :  { %14 = vsyncpa [#allocation5 + $0x1], 0 }
   0x4   :  { %15 = vsyncpa [#allocation7], 0 }
   0x5   :  { %17 = vsyncpa [#allocation7 + $0x1], 0  ;;  %s1371_s21 = smov 0   ;;  %s1373_s22 = smov 0  }
   0x6   :  { %s1375_s23 = smov 0   ;;  %s1377_s24 = smov 0  }
   0x7   :  { %s1379_s25 = smov 0   ;;  %s1381_s26 = smov 0  }
   0x8   :  { %s1383_s27 = smov 0   ;;  %s1385_s28 = smov 0  }
   0x9 LB: > { %s998_s29 = sadd.s32 4294967295, %s1324_s28   ;;  %s999_s30 = sadd.s32 4294967294, %s1324_s28   ;;  %s1324_s28 = sphi %s1385_s28, %s23_s28   ;;  %s1320_s27 = sphi %s1383_s27, %s1689_s27   ;;  %s1316_s26 = sphi %s1381_s26, %s1688_s26   ;;  %s1312_s25 = sphi %s1379_s25, %s1687_s25   ;;  %s1308_s24 = sphi %s1377_s24, %s1686_s24   ;;  %s1304_s23 = sphi %s1375_s23, %s1685_s23   ;;  %s1300_s22 = sphi %s1373_s22, %s1684_s22   ;;  %s1296_s21 = sphi %s1371_s21, %s1683_s21  }
   0xa   : > { %s32_s7 = sadd.s32 1, %s1316_s26  ;;  %s35_s8 = sadd.s32 1, %s1320_s27 }
   0xb   : > { %p33_p0 = scmp.ge.s32.totalorder %s32_s7, 3  ;;  %p51_p1 = scmp.ne.s32.totalorder %s1304_s23, %s1300_s22 }
   0xc   : > { %p52_p2 = scmp.eq.s32.totalorder %s1324_s28, 0  ;;  %p167_p5 = scmp.eq.s32.totalorder %s998_s29, 5 }
   0xd   : > { %s1691_s7 = smov (%p33_p0, %s32_s7), 0  ;;  %s1693_s8 = smov (!%p33_p0, %s35_s8), %s1320_s27 }
   0xe   : > { %s40_s9 = ssub.s32 %s1316_s26, %s1691_s7  ;;  %p1423_p3 = por %p52_p2, %p51_p1 }
   0xf   : > { %p37_p4 = scmp.ge.s32.totalorder %s1693_s8, 2  ;;  %p172_p6 = scmp.ne.s32.totalorder %s1300_s22, %s1296_s21 }
  0x10   : > { %p173_p7 = scmp.eq.s32.totalorder %s999_s30, 5  ;;  %p1431_p8 = por %p167_p5, %p51_p1 }
  0x11   : > { %s1695_s8 = smov (%p37_p4, %s1693_s8), 0  ;;  %s44_s15 = sadd.s32 1, %s1304_s23 }
  0x12   : > { %1677 = sst [smem:[#allocation10_spill]] %s1695_s8  ;;  %p1435_p9 = por %p173_p7, %p172_p6 }
  0x13   : > { %s39_s13 = ssub.s32 %s1320_s27, %s1695_s8  ;;  %p1001_p11 = scmp.ge.s32.totalorder %s1324_s28, 6 }
  0x14   : > { %s41_s14 = sor.u32 %s40_s9, %s39_s13 }
  0x15   : > { %p42_p10 = scmp.eq.s32.totalorder %s41_s14, 0  ;;  %229 = sbr.rel (%p1001_p11) target bundleno = 37 (0x25), region = 32 }
  0x17   : > { %s1443_s16 = scalar_select %p42_p10, %s1304_s23, %s44_s15  }
  0x1a   : > { %232 = sbr.rel (!%p1423_p3) target bundleno = 37 (0x25), region = 36  ;;  %s234_s17 = sand.u32 (%p1423_p3), 1, %s1304_s23  }
  0x1b   : > { %s1105_s18 = smul.u32 (%p1423_p3), 6, %s1320_s27  ;;  %s1002_s19 = sshll.u32 (%p1423_p3), %s234_s17, 4 }
  0x1c   : > { %s1680_s0 = sld [smem:[#allocation11_spill]] (%p1423_p3)  ;;  %s236_s14 = scalar_lea.vmem (%p1423_p3), [#allocation3], %s1002_s19 }
  0x1d   : > { %s238_s20 = sadd.s32 (%p1423_p3), %s1316_s26, %s1105_s18 }
  0x1e   : > { %s1003_s29 = sshll.u32 (%p1423_p3), %s238_s20, 3 }
  0x22   : > { %s240_s13 = scalar_lea.vmem %s1680_s0, %s1003_s29 }
  0x23   : > { %v271_v0 = vld [vmem:[%s240_s13] sm:$0xff]  ;;  %v273_v1 = vld [vmem:[%s240_s13 + $0x18] sm:$0xff] }
  0x24   : > { %272 = vst [vmem:[%s236_s14] sm:$0xff] %v271_v0  ;;  %274 = vst [vmem:[%s236_s14 + $0x8] sm:$0xff] %v273_v1 }
  0x25 PF: > { %p1004_p12 = scmp.ge.s32.totalorder %s1324_s28, 1  ;;  %p279_p13 = scmp.lt.s32.totalorder %s1324_s28, 7 }
  0x27   : > { %p280_p0 = pnand %p1004_p12, %p279_p13 }
  0x28   : > { %s1457_s10 = sand.u32 (!%p280_p0), 1, %s1300_s22   ;;  %p1008_p1 = scmp.ne.s32.totalorder (!%p280_p0), %s1308_s24, 0 }
  0x29   : > { %283 = sbr.rel (%p280_p0) target bundleno = 661 (0x295), region = 74  ;;  %s1005_s15 = sshll.u32 (!%p280_p0), %s1457_s10, 4 }
  0x2a   : > { %s288_s17 = scalar_lea.vmem (!%p280_p0), [#allocation3], %s1005_s15  ;;  %s1464_s18 = scalar_lea.vmem (!%p280_p0), [#allocation4], %s1005_s15 }
  0x2b   : > { %s1466_s19 = scalar_lea.vmem (!%p280_p0), [#allocation6], %s1005_s15 }
  0x2e   : > { %v1460_v2 = vld [vmem:[%s288_s17] sm:$0xff]  ;;  %v1462_v3 = vld [vmem:[%s288_s17 + $0x8] sm:$0xff]  ;;  %325 = sbr.rel (%p1008_p1) target bundleno = 53 (0x35), region = 82 }
  0x33   : > { %vm326_vm0 = vcmask 31744   ;;  %v1326_v4 = vmov 0.0  }
  0x34   : > { %327 = vst.msk [vmem:[#allocation2] sm:$0xff] %vm326_vm0, %v1326_v4  ;;  %328 = vst.msk [vmem:[#allocation2 + $0x8] sm:$0xff] %vm326_vm0, %v1326_v4 }
  0x35 PF: > { %1075 = vmatprep.subr.mxu1 %v1462_v3  ;;  %v347_v6 = vld [vmem:[%s1668_s1] sm:$0xff]  ;;  %s1327_s30 = smov 4   ;;  %s1328_s9 = smov 126   ;;  %vm351_vm1 = vcmask 130048   ;;  %v1010_v8 = vld [vmem:[%s1668_s1 + $0x48] sm:$0xff]  ;;  %v1011_v9 = vld [vmem:[%s1668_s1 + $0x50] sm:$0xff] }
  0x36   : > { %340 = vrot.lane.b32.xlu0 %v1462_v3, %s1327_s30  ;;  %v1009_v7 = vld [vmem:[%s1668_s1 + $0x40] sm:$0xff]  ;;  %1076 = vmatpush3.msra.mxu1 %v1462_v3  ;;  %s1329_s13 = smov 2   ;;  %v1012_v11 = vld [vmem:[%s1668_s1 + $0x58] sm:$0xff]  ;;  %v1330_v12 = vmov 0   ;;  %v671_v14 = vld [vmem:[%s1669_s2 + $0x10] sm:$0xff]  ;;  %vm344_vm2 = vcmask 31744  }
  0x37   : > { %1069 = vmatprep.mubr.msk.f32.mxu0 %vm351_vm1, %v347_v6  ;;  %1077 = vmatprep.subr.mxu1 %v1460_v2  ;;  %v672_v13 = vld [vmem:[%s1669_s2 + $0x18] sm:$0xff]  ;;  %v669_v15 = vld [vmem:[%s1669_s2] sm:$0xff]  ;;  %v670_v16 = vld [vmem:[%s1669_s2 + $0x8] sm:$0xff]  ;;  %vm560_vm3 = vcmask 15360   ;;  %s864_s15 = sshll.u32 %s1464_s18, 4  ;;  %s1574_s15 = int_to_ptr.vmem [resolvable:$true] %s864_s15 }
  0x38   : > { %1079 = vmatprep.mubr.msk.f32.mxu1 %vm351_vm1, %v1009_v7  ;;  %1078 = vmatpush3.msra.mxu1 %v1460_v2  ;;  %v718_v17 = vld [vmem:[%s1671_s4 + $0x8] sm:$0xff]  ;;  %v717_v18 = vld [vmem:[%s1671_s4] sm:$0xff]  ;;  %v720_v19 = vld [vmem:[%s1671_s4 + $0x18] sm:$0xff] }
  0x39   : > { %1080 = vmatmul.mubr.msk.f32.vlgmr.msra.gmra.mxu1 %vm351_vm1, %v1010_v8  ;;  %1192 = vset.pattern.permute.xlu0 %v1330_v12  ;;  %v719_v20 = vld [vmem:[%s1671_s4 + $0x10] sm:$0xff]  ;;  %v348_v27 = vld [vmem:[%s1668_s1 + $0x8] sm:$0xff]  ;;  %v350_v32 = vld [vmem:[%s1668_s1 + $0x18] sm:$0xff] }
  0x3a   : > { %338 = vrot.lane.b32.xlu0 %v1460_v2, %s1327_s30  ;;  %1082 = vmatprep.mubr.msk.f32.mxu1 %vm351_vm1, %v1011_v9  ;;  %v349_v28 = vld [vmem:[%s1668_s1 + $0x10] sm:$0xff]  ;;  %v1021_v34 = vld [vmem:[%s1668_s1 + $0x20] sm:$0xff]  ;;  %v1022_v35 = vld [vmem:[%s1668_s1 + $0x28] sm:$0xff] }
  0x3b   : > { %v335_v5 = vld [vmem:[#allocation2 + $0x8] sm:$0xff]  ;;  %v334_v10 = vld [vmem:[#allocation2] sm:$0xff]  ;;  %1193 = vset.pattern.permute.xlu1 %v1330_v12  ;;  %v1023_v36 = vld [vmem:[%s1668_s1 + $0x30] sm:$0xff] }
  0x3c   : > { %550 = vrot.lane.b32.xlu1 %v335_v5, %s1328_s9  ;;  %v1024_v37 = vld [vmem:[%s1668_s1 + $0x38] sm:$0xff]  ;;  %v713_v38 = vld [vmem:[%s1670_s3] sm:$0xff] }
  0x3d   : > { %1083 = vmatmul.mubr.msk.f32.gmra.mxu1 %vm351_vm1, %v1012_v11 }
  0x3e   : > { %548 = vrot.lane.b32.xlu0 %v334_v10, %s1328_s9  ;;  %1099 = vmatprep.mubr.msk.f32.mxu1 %vm351_vm1, %v713_v38  ;;  %s1106_s9 = smul.u32 6, %s1312_s25 }
  0x40   : > { %556 = vrot.lane.b32.xlu1 %v1462_v3, %s1329_s13 }
  0x42   : > { %690 = vperm.xlu0 %1192, %v672_v13  }
  0x44   : > { %554 = vrot.lane.b32.xlu1 %v1460_v2, %s1329_s13  ;;  %s861_s13 = sadd.s32 %s1308_s24, %s1106_s9  ;;  %s881_s24 = sshll.u32 %s1466_s19, 4  ;;  %s1586_s24 = int_to_ptr.vmem [resolvable:$true] %s881_s24 }
  0x45   : > { %s1037_s30 = sshll.u32 %s861_s13, 7  ;;  %s1202_s9 = scalar_lea.vmem %s1574_s15, 256 }
  0x46   : > { %675 = vperm.xlu0 %1192, %v669_v15   ;;  %v714_v15 = vld [vmem:[%s1670_s3 + $0x8] sm:$0xff]  ;;  %s1572_s0 = scalar_lea.hbm %s1672_s5, %s1037_s30  ;;  %s1584_s8 = scalar_lea.hbm %s1673_s6, %s1037_s30 }
  0x47   : > { %p1203_p2 = scmp.ne.s32.totalorder %s1574_s15, %s1202_s9  ;;  %s1331_s13 = smov [#allocation4]  }
  0x48   : > { %685 = vperm.xlu1 %1193, %v671_v14   ;;  %s1206_s17 = sshll.u32 %s1331_s13, 4  ;;  %s1207_s17 = int_to_ptr.vmem [resolvable:$false] %s1206_s17 }
  0x49   : > { %p1204_p3 = pnand %p1203_p2, %p1431_p8  ;;  %s1208_s20 = scalar_lea.vmem %s1207_s17, 512 }
  0x4a   : > { %728 = vperm.xlu0 %1192, %v718_v17   ;;  %v716_v17 = vld [vmem:[%s1670_s3 + $0x18] sm:$0xff]  ;;  %p1209_p5 = scmp.lt.s32.totalorder %s1574_s15, %s1207_s17  ;;  %p1210_p6 = scmp.lt.s32.totalorder %s1208_s20, %s1202_s9 }
  0x4b   : > { %p1205_p4 = pneg %p1204_p3 }
  0x4c   : > { %680 = vperm.xlu1 %1193, %v670_v16   ;;  %v715_v16 = vld [vmem:[%s1670_s3 + $0x10] sm:$0xff]  ;;  %p1211_p7 = por %p1210_p6, %p1209_p5 }
  0x4e   : > { %738 = vperm.xlu0 %1192, %v720_v19   ;;  %p1212_p10 = pnand %p1211_p7, %p1205_p4 }
  0x50   : > { %723 = vperm.xlu1 %1193, %v717_v18  }
  0x54   : > { %733 = vperm.xlu1 %1193, %v719_v20  }
  0xa8   : > { %v341_v21 = vpop.permute.xlu0 %340 }
  0xa9   : > { %698 = vst.msk [vmem:[#allocation2 + $0x8] sm:$0xff] %vm344_vm2, %v341_v21  ;;  %v346_v23 = vsel %vm344_vm2, %v335_v5, %v341_v21 }
  0xaa   : > { %1065 = vmatprep.subr.mxu0 %v346_v23 }
  0xab   : > { %1066 = vmatpush3.msra.mxu0 %v346_v23 }
  0xac   : > { %v339_v24 = vpop.permute.xlu0 %338 }
  0xad   : > { %697 = vst.msk [vmem:[#allocation2] sm:$0xff] %vm344_vm2, %v339_v24  ;;  %v345_v26 = vsel %vm344_vm2, %v334_v10, %v339_v24 }
  0xae   : > { %v551_v22 = vpop.permute.xlu1 %550  ;;  %1067 = vmatprep.subr.mxu0 %v345_v26 }
  0xaf   : > { %1068 = vmatpush3.msra.mxu0 %v345_v26 }
  0xb0   : > { %1070 = vmatmul.mubr.msk.f32.vlgmr.msra.gmra.mxu0 %vm351_vm1, %v348_v27  ;;  %v549_v31 = vpop.permute.xlu0 %548 }
  0xb1   : > { %1072 = vmatprep.mubr.msk.f32.mxu0 %vm351_vm1, %v349_v28 }
  0xb2   : > { %v557_v25 = vpop.permute.xlu1 %556 }
  0xb3   : > { %v562_v29 = vsel %vm560_vm3, %v551_v22, %v557_v25 }
  0xb4   : > { %1085 = vmatprep.subr.mxu0 %v562_v29  ;;  %1073 = vmatmul.mubr.msk.f32.gmra.mxu0 %vm351_vm1, %v350_v32 }
  0xb5   : > { %1086 = vmatpush3.msra.mxu0 %v562_v29  ;;  %1089 = vmatprep.mubr.msk.f32.mxu0 %vm351_vm1, %v1021_v34 }
  0xb6   : > { %v555_v30 = vpop.permute.xlu1 %554 }
  0xb7   : > { %v561_v33 = vsel %vm560_vm3, %v549_v31, %v555_v30 }
  0xb8   : > { %1087 = vmatprep.subr.mxu0 %v561_v33 }
  0xb9   : > { %1088 = vmatpush3.msra.mxu0 %v561_v33 }
  0xba   : > { %1090 = vmatmul.mubr.msk.f32.vlgmr.msra.gmra.mxu0 %vm351_vm1, %v1022_v35 }
  0xbb   : > { %1092 = vmatprep.mubr.msk.f32.mxu0 %vm351_vm1, %v1023_v36 }
  0xbd   : > { %v691_v53 = vpop.permute.xlu0 %690 }
  0xbe   : > { %1093 = vmatmul.mubr.msk.f32.gmra.mxu0 %vm351_vm1, %v1024_v37 }
  0xc1   : > { %v676_v10 = vpop.permute.xlu0 %675 }
  0xc3   : > { %v686_v57 = vpop.permute.xlu1 %685 }
  0xc5   : > { %v729_v18 = vpop.permute.xlu0 %728 }
  0xc7   : > { %v681_v7 = vpop.permute.xlu1 %680 }
  0xc9   : > { %v739_v25 = vpop.permute.xlu0 %738 }
  0xcb   : > { %v724_v19 = vpop.permute.xlu1 %723 }
  0xf9   : > { %v1081_v39 = vpop.f32.mrf.mxu1 }
  0xfb   : > { %v527_v42 = vpop.f32.mrf.mxu1 }
  0xfd   : > { %v1084_v44 = vpop.f32.mrf.mxu1 }
  0xff   : > { %v537_v47 = vpop.f32.mrf.mxu1 }
 0x170   : > { %v1071_v40 = vpop.f32.mrf.mxu0 }
 0x171   : > { %v533_v1 = vadd.f32 %v1081_v39, %v1071_v40 }
 0x172   : > { %v430_v41 = vpop.f32.mrf.mxu0 }
 0x173   : > { %v528_v4 = vadd.f32 %v527_v42, %v430_v41 }
 0x174   : > { %v1074_v43 = vpop.f32.mrf.mxu0 }
 0x175   : > { %v543_v49 = vadd.f32 %v1084_v44, %v1074_v43 }
 0x176   : > { %v440_v45 = vpop.f32.mrf.mxu0 }
 0x177   : > { %v538_v51 = vadd.f32 %v537_v47, %v440_v45 }
 0x17a   : > { %v1091_v46 = vpop.f32.mrf.mxu0 }
 0x17b   : > { %v666_v5 = vadd.f32 %v1091_v46, %v533_v1 }
 0x17c   : > { %v646_v48 = vpop.f32.mrf.mxu0 }
 0x17d   : > { %v665_v6 = vadd.f32 %v646_v48, %v528_v4  ;;  %v694_v8 = vadd.f32 %v681_v7, %v666_v5 }
 0x17e   : > { %v1094_v50 = vpop.f32.mrf.mxu0 }
 0x17f   : > { %v668_v52 = vadd.f32 %v1094_v50, %v543_v49  ;;  %v693_v11 = vadd.f32 %v676_v10, %v665_v6 }
 0x180   : > { %v656_v54 = vpop.f32.mrf.mxu0 }
 0x181   : > { %v696_v55 = vadd.f32 %v691_v53, %v668_v52  ;;  %v667_v56 = vadd.f32 %v656_v54, %v538_v51 }
 0x183   : > { %v1030_v58 = vmul.f32 -1.442695, %v696_v55  ;;  %v695_v59 = vadd.f32 %v686_v57, %v667_v56 }
 0x185   : > { %1194 = vpow2.f32 %v1030_v58  ;;  %v1029_v60 = vmul.f32 -1.442695, %v695_v59 }
 0x187   : > { %1196 = vpow2.f32 %v1029_v60 }
 0x192   : > { %v1195_v61 = vpop.eup %1194 }
 0x193   : > { %v706_v62 = vadd.f32 1.0, %v1195_v61 }
 0x194   : > { %v1197_v63 = vpop.eup %1196 }
 0x195   : > { %1198 = vrcp.f32 %v706_v62  ;;  %v705_v0 = vadd.f32 1.0, %v1197_v63 }
 0x197   : > { %1200 = vrcp.f32 %v705_v0 }
 0x1a2   : > { %v1199_v9 = vpop.eup %1198 }
 0x1a3   : > { %v712_v12 = vmul.f32 %v1199_v9, %v694_v8 }
 0x1a4   : > { %v1201_v13 = vpop.eup %1200 }
 0x1a5   : > { %1095 = vmatprep.subr.mxu1 %v712_v12  ;;  %v711_v14 = vmul.f32 %v1201_v13, %v693_v11 }
 0x1a6   : > { %1096 = vmatpush3.msra.mxu1 %v712_v12 }
 0x1a7   : > { %1097 = vmatprep.subr.mxu1 %v711_v14 }
 0x1a8   : > { %1098 = vmatpush3.msra.mxu1 %v711_v14 }
 0x1a9   : > { %1100 = vmatmul.mubr.msk.f32.vlgmr.msra.gmra.mxu1 %vm351_vm1, %v714_v15 }
 0x1aa   : > { %1102 = vmatprep.mubr.msk.f32.mxu1 %vm351_vm1, %v715_v16 }
 0x1ad   : > { %1103 = vmatmul.mubr.msk.f32.gmra.mxu1 %vm351_vm1, %v716_v17 }
 0x269   : > { %v1101_v20 = vpop.f32.mrf.mxu1 }
 0x26a   : > { %v825_v21 = vadd.f32 %v1101_v20, %v729_v18 }
 0x26b   : > { %v819_v22 = vpop.f32.mrf.mxu1 }
 0x26c   : > { %v839_v23 = vadd.f32 %v825_v21, %v1462_v3  ;;  %v820_v24 = vadd.f32 %v819_v22, %v724_v19  ;;  %v734_v3 = vpop.permute.xlu1 %733 }
 0x26d   : > { %v1104_v26 = vpop.f32.mrf.mxu1 }
 0x26e   : > { %841 = vst [vmem:[%s1464_s18 + $0x8] sm:$0xff] %v839_v23  ;;  %v838_v27 = vadd.f32 %v820_v24, %v1460_v2  ;;  %v835_v28 = vadd.f32 %v1104_v26, %v739_v25 }
 0x26f   : > { %v829_v29 = vpop.f32.mrf.mxu1 }
 0x270   : > { %840 = vst [vmem:[%s1464_s18] sm:$0xff] %v838_v27  ;;  %843 = vst [vmem:[%s1466_s19 + $0x8] sm:$0xff] %v835_v28  ;;  %v830_v30 = vadd.f32 %v829_v29, %v734_v3 }
 0x271   : > { %1215 = shalt.err (!%p1212_p10)
}
 0x272   : > { %s1216_s18 = scalar_lea.hbm %s1572_s0, 256  ;;  %s1220_s29 = scalar_lea.hbm %s1672_s5, 1536 }
 0x273   : > { %p1217_p11 = scmp.ne.s32.totalorder %s1572_s0, %s1216_s18  ;;  %p1221_p0 = scmp.lt.s32.totalorder %s1572_s0, %s1672_s5 }
 0x274   : > { %p1222_p1 = scmp.lt.s32.totalorder %s1220_s29, %s1216_s18 }
 0x275   : > { %p1218_p12 = pnand %p1217_p11, %p1431_p8 }
 0x276   : > { %p1223_p2 = por %p1222_p1, %p1221_p0 }
 0x277   : > { %p1219_p13 = pneg %p1218_p12 }
 0x279   : > { %p1224_p3 = pnand %p1223_p2, %p1219_p13 }
 0x27b   : > { %1227 = shalt.err (!%p1224_p3)
}
 0x27c   : > { %s1332_s9 = smov 128   ;;  %s1333_s17 = smov 384   ;;  %842 = vst [vmem:[%s1466_s19] sm:$0xff] %v830_v30 }
 0x27d   : > { %s1334_s20 = smov 8   ;;  %s1681_s14 = scalar_lea.sflag [#allocation5], %s1457_s10 }
 0x27e   : > { %1108 = dma.vmem_to_hbm [thread:$0]  (%p1431_p8), %s1574_s15, 256, %s1572_s0, %s1681_s14, %s1332_s9, %s1333_s17, %s1334_s20  }
 0x27f   : > { %s850_s18 = scalar_lea.sflag [#allocation7], %s1457_s10  ;;  %s1228_s30 = scalar_lea.vmem %s1586_s24, 256 }
 0x280   : > { %p1229_p4 = scmp.ne.s32.totalorder %s1586_s24, %s1228_s30  ;;  %s1335_s25 = smov [#allocation6]  }
 0x281   : > { %s1232_s29 = sshll.u32 %s1335_s25, 4  ;;  %s1233_s29 = int_to_ptr.vmem [resolvable:$false] %s1232_s29 }
 0x282   : > { %p1230_p5 = pnand %p1229_p4, %p1431_p8  ;;  %s1234_s13 = scalar_lea.vmem %s1233_s29, 512 }
 0x283   : > { %p1235_p7 = scmp.lt.s32.totalorder %s1586_s24, %s1233_s29  ;;  %p1236_p10 = scmp.lt.s32.totalorder %s1234_s13, %s1228_s30 }
 0x284   : > { %p1231_p6 = pneg %p1230_p5 }
 0x285   : > { %p1237_p11 = por %p1236_p10, %p1235_p7 }
 0x287   : > { %p1238_p12 = pnand %p1237_p11, %p1231_p6 }
 0x289   : > { %1241 = shalt.err (!%p1238_p12)
}
 0x28a   : > { %s1242_s19 = scalar_lea.hbm %s1584_s8, 256  ;;  %s1246_s0 = scalar_lea.hbm %s1673_s6, 1536 }
 0x28b   : > { %p1243_p13 = scmp.ne.s32.totalorder %s1584_s8, %s1242_s19  ;;  %p1247_p2 = scmp.lt.s32.totalorder %s1584_s8, %s1673_s6 }
 0x28c   : > { %p1248_p3 = scmp.lt.s32.totalorder %s1246_s0, %s1242_s19 }
 0x28d   : > { %p1244_p0 = pnand %p1243_p13, %p1431_p8 }
 0x28e   : > { %p1249_p4 = por %p1248_p3, %p1247_p2 }
 0x28f   : > { %p1245_p1 = pneg %p1244_p0 }
 0x291   : > { %p1250_p5 = pnand %p1249_p4, %p1245_p1 }
 0x293   : > { %1253 = shalt.err (!%p1250_p5)
}
 0x294   : > { %1109 = dma.vmem_to_hbm [thread:$0]  (%p1431_p8), %s1586_s24, 256, %s1584_s8, %s850_s18, %s1332_s9, %s1333_s17, %s1334_s20  }
 0x295 PF: > { %p1119_p6 = scmp.ge.s32.totalorder %s1324_s28, 2  ;;  %s896_s30 = sand.u32 1, %s1296_s21  }
 0x296   : > { %s897_s29 = scalar_lea.sflag [#allocation5], %s896_s30 }
 0x297   : > { %p1113_p7 = pnand %p1119_p6, %p1435_p9 }
 0x299   : > { %p1114_p10 = pneg %p1113_p7 }
 0x29b   : > { %1287 = dma.done.wait (%p1114_p10), %s897_s29, 256  }
 0x29c   : > { %1289 = vsyncadd (%p1114_p10), %s897_s29, 4294967040  ;;  %s906_s13 = scalar_lea.sflag [#allocation7], %s896_s30 }
 0x29d   : > { %1291 = dma.done.wait (%p1114_p10), %s906_s13, 256  }
 0x29e   : > { %1293 = vsyncadd (%p1114_p10), %s906_s13, 4294967040  ;;  %s23_s28 = sadd.s32 1, %s1324_s28   ;;  %s1682_s11 = sld [smem:[#allocation10_spill]] }
 0x29f   : > { %p20_p11 = scmp.ge.s32.totalorder %s23_s28, 8   ;;  %s1683_s21 = smov %s1300_s22 }
 0x2a0   : > { %s1684_s22 = smov %s1304_s23  ;;  %s1685_s23 = smov %s1443_s16 }
 0x2a1   : > { %s1686_s24 = smov %s1316_s26  ;;  %s1687_s25 = smov %s1320_s27 }
 0x2a2   : > { %s1688_s26 = smov %s1691_s7  ;;  %22 = sbr.rel (!%p20_p11) target bundleno = 9 (0x9), region = 141 }
 0x2a4   : > { %s1689_s27 = smov %s1682_s11 }
 0x2a7   :  { %911 = vsyncpa [#allocation5], 1 }
 0x2a8   :  { %913 = vsyncpa [#allocation5 + $0x1], 1 }
 0x2a9   :  { %914 = vsyncpa [#allocation7], 1 }
 0x2aa   :  { %916 = vsyncpa [#allocation7 + $0x1], 1 }

</bundles_post_ra>
